<compile_context>
chip_gen: v5e
topology: v5e:2x2
jax: 0.10.0
libtpu: 0.0.40
codegen_flags: <defaults>
</compile_context>

<pallas_src>
import functools

import jax
import jax.numpy as jnp
import numpy as np
from jax.experimental import pallas as pl
from jax.experimental.pallas import tpu as pltpu


# ----------------------------------------------------------------------------
# Positional-encoding table (init-time work of the torch module).
# ----------------------------------------------------------------------------
def _make_pe(embed_size: int, max_len: int = 512, N: float = 1000.0,
             dtype=jnp.float32) -> jnp.ndarray:
    """Precompute the positional-encoding table (max_len, embed_size)."""
    if embed_size % 2 != 0:
        raise ValueError("embed_size must be even (same limitation as the torch module)")
    position = np.arange(0, max_len, dtype=np.float32)[:, None]               # (max_len, 1)
    w_i = np.exp(np.arange(0, embed_size, 2, dtype=np.float32)
                 * (-np.log(N) / embed_size))                                  # (embed//2,)
    pe = np.zeros((max_len, embed_size), dtype=np.float32)
    pe[:, 0::2] = np.sin(position * w_i)
    pe[:, 1::2] = np.cos(position * w_i)
    return jnp.asarray(pe, dtype=dtype)


# ----------------------------------------------------------------------------
# Kernels.
# ----------------------------------------------------------------------------
def _pe_add_kernel_folded(x_ref, pe_ref, o_ref, *, batch):
    # x_ref / o_ref : (seq_tile, batch*embed)  VMEM tiles (lane-dense last dim)
    # pe_ref        : (seq_tile, embed)        VMEM tile
    pe = pe_ref[...]
    if batch > 1:
        # Replicate pe across the folded batch axis in-register.  Only used when
        # embed % 128 == 0, so the replication happens at vreg-aligned lane
        # offsets (cheap copies, no extra HBM traffic).
        pe = jnp.tile(pe, (1, batch))
    o_ref[...] = x_ref[...] + pe


def _pe_add_kernel_3d(x_ref, pe_ref, o_ref):
    # x_ref / o_ref : (seq_tile, batch, embed) VMEM tiles
    # pe_ref        : (seq_tile, 1, embed)     VMEM tile -> plain broadcast add
    o_ref[...] = x_ref[...] + pe_ref[...]


# ----------------------------------------------------------------------------
# Tiling heuristics (padding- and device-aware).
# ----------------------------------------------------------------------------
def _round_up(v: int, m: int) -> int:
    return ((v + m - 1) // m) * m


def _sublane_min(itemsize: int) -> int:
    # Packed sublane minimum: 8 for 4-byte, 16 for 2-byte, 32 for 1-byte dtypes.
    return max(8, 32 // max(1, itemsize))


def _device_budgets():
    """Returns (target_x_tile_bytes, vmem_limit_bytes, force_two_grid_steps)."""
    try:
        kind = jax.devices()[0].device_kind.lower()
    except Exception:
        kind = ""
    if "7" in kind:
        # v7x: only 64 MiB VMEM per TensorCore; keep tiles modest and make sure
        # the 'parallel' grid axis has >=2 steps so both TCs get work.
        return 5 * 2**20, 48 * 2**20, True
    if "v6" in kind or "6e" in kind:
        # v6e: 128 MiB VMEM; bigger tiles amortize per-grid-step overhead.
        return 8 * 2**20, 64 * 2**20, False
    if "v5" in kind:
        # v5e: 128 MiB VMEM, lowest HBM BW -> big unmasked-store tiles matter most.
        return 8 * 2**20, 64 * 2**20, False
    # Unknown device: conservative defaults.
    return 4 * 2**20, 32 * 2**20, False


def _choose_seq_tile(seq_len, batch, embed, itemsize, *, fold,
                     target_tile_bytes, vmem_limit_bytes, min_grid_steps):
    """Pick a seq tile using *padded* VMEM bytes (sublane/lane rounding)."""
    sub = _sublane_min(itemsize)
    lanes_e = _round_up(embed, 128)
    if fold:
        x_row = _round_up(batch * embed, 128) * itemsize      # per seq row, padded
        pe_row = lanes_e * itemsize
    else:
        x_row = _round_up(batch, sub) * lanes_e * itemsize    # (batch, embed) slab
        pe_row = sub * lanes_e * itemsize                     # (1, embed) slab
    # Double-buffered input + output + pe per seq row; keep headroom under limit.
    per_row_db = 2 * (2 * x_row + pe_row)

    rows_target = max(1, target_tile_bytes // max(1, x_row))
    rows_budget = max(1, int(0.7 * vmem_limit_bytes) // max(1, per_row_db))
    rows = min(rows_target, rows_budget)
    rows = max(sub, (rows // sub) * sub)

    if min_grid_steps > 1 and seq_len > sub:
        # Cap the tile so the grid has at least `min_grid_steps` steps (v7x 2 TCs).
        rows = min(rows, _round_up(pl.cdiv(seq_len, min_grid_steps), sub))

    if rows >= seq_len:
        rows = seq_len            # single full-extent block (always layout-legal)
    return int(rows)


# ----------------------------------------------------------------------------
# Forward pass.
# ----------------------------------------------------------------------------
@functools.partial(jax.jit, static_argnames=("seq_tile", "vmem_limit", "donate_x"))
def _pe_forward(x, pe, *, seq_tile, vmem_limit, donate_x):
    seq_len, batch, embed = x.shape
    itemsize = jnp.dtype(x.dtype).itemsize

    # Keep pe in x's dtype so the kernel moves the minimum number of bytes.
    pe = pe.astype(x.dtype)

    fold = (batch == 1) or (embed % 128 == 0)
    single = seq_tile >= seq_len
    tile = seq_len if single else seq_tile
    grid = (pl.cdiv(seq_len, tile),)          # ragged tail: padded reads, dropped writes

    cparams = pltpu.CompilerParams(
        dimension_semantics=("parallel",),    # independent seq tiles -> shard across TCs
        vmem_limit_bytes=int(vmem_limit),
    )
    cost = pl.CostEstimate(
        flops=seq_len * batch * embed,
        transcendentals=0,
        bytes_accessed=2 * seq_len * batch * embed * itemsize + seq_len * embed * itemsize,
    )
    io_alias = {0: 0} if donate_x else {}

    if fold:
        # Lane-dense path: fold (batch, embed) into one contiguous lane axis.
        # The reshape is a free bitcast (x is contiguous row-major).
        x2 = x.reshape(seq_len, batch * embed)
        pe_in = pe[:seq_len] if single else pe     # slice only for the 1-block case
        out2 = pl.pallas_call(
            functools.partial(_pe_add_kernel_folded, batch=batch),
            out_shape=jax.ShapeDtypeStruct((seq_len, batch * embed), x.dtype),
            grid=grid,
            in_specs=[
                pl.BlockSpec((tile, batch * embed), lambda s: (s, 0)),
                pl.BlockSpec((tile, embed),
                             (lambda s: (0, 0)) if single else (lambda s: (s, 0))),
            ],
            out_specs=pl.BlockSpec((tile, batch * embed), lambda s: (s, 0)),
            compiler_params=cparams,
            cost_estimate=cost,
            input_output_aliases=io_alias,
        )(x2, pe_in)
        return out2.reshape(seq_len, batch, embed)

    # Fallback (embed not a multiple of 128 and batch > 1): keep 3-D blocks whose
    # last two dims equal the full array dims (always layout-legal), with pe
    # presented as (tile, 1, embed) so the add is a plain sublane broadcast.
    pe3 = (pe[:seq_len] if single else pe)[:, None, :]
    return pl.pallas_call(
        _pe_add_kernel_3d,
        out_shape=jax.ShapeDtypeStruct((seq_len, batch, embed), x.dtype),
        grid=grid,
        in_specs=[
            pl.BlockSpec((tile, batch, embed), lambda s: (s, 0, 0)),
            pl.BlockSpec((tile, 1, embed),
                         (lambda s: (0, 0, 0)) if single else (lambda s: (s, 0, 0))),
        ],
        out_specs=pl.BlockSpec((tile, batch, embed), lambda s: (s, 0, 0)),
        compiler_params=cparams,
        cost_estimate=cost,
        input_output_aliases=io_alias,
    )(x, pe3)


def positional_encoding_forward(x: jnp.ndarray, pe: jnp.ndarray, *,
                                seq_tile=None, donate_x: bool = False) -> jnp.ndarray:
    """x: (seq_len, batch, embed); pe: (max_len, embed), max_len >= seq_len."""
    seq_len, batch, embed = x.shape
    max_len, pe_embed = pe.shape
    if pe_embed != embed:
        raise ValueError("pe embed dim mismatch")
    if max_len < seq_len:
        raise ValueError("sequence longer than the precomputed pe table")

    itemsize = jnp.dtype(x.dtype).itemsize
    sub = _sublane_min(itemsize)
    fold = (batch == 1) or (embed % 128 == 0)
    target_tile_bytes, vmem_limit, force_two_steps = _device_budgets()

    if seq_tile is None:
        seq_tile = _choose_seq_tile(
            seq_len, batch, embed, itemsize, fold=fold,
            target_tile_bytes=target_tile_bytes, vmem_limit_bytes=vmem_limit,
            min_grid_steps=2 if force_two_steps else 1)
    else:
        if seq_tile < seq_len and seq_tile % sub != 0:
            raise ValueError(
                f"seq_tile must be a multiple of {sub} for dtype {x.dtype} "
                f"(or >= seq_len for a single full block)")

    return _pe_forward(x, pe, seq_tile=int(seq_tile),
                       vmem_limit=int(vmem_limit), donate_x=bool(donate_x))


# ----------------------------------------------------------------------------
# Demo / self-test (small shapes consistent with the module's forward).
# ----------------------------------------------------------------------------
if __name__ == "__main__":
    key = jax.random.PRNGKey(0)
    k1, k2, k3 = jax.random.split(key, 3)

    # Case 1: embed NOT a multiple of 128 -> 3-D broadcast fallback path.
    #         seq_tile=8 gives a 3-step pipelined grid with a ragged tail tile.
    seq_len, batch, embed = 20, 2, 32
    pe32 = _make_pe(embed, max_len=512, N=1000.0)
    x1 = jax.random.normal(k1, (seq_len, batch, embed), dtype=jnp.float32)
    ref1 = x1 + pe32[:seq_len][:, None, :]
    out1 = jax.block_until_ready(positional_encoding_forward(x1, pe32, seq_tile=8))
    np.testing.assert_allclose(np.asarray(out1), np.asarray(ref1), rtol=1e-6, atol=1e-6)
    out1a = jax.block_until_ready(positional_encoding_forward(x1, pe32))   # auto tile
    np.testing.assert_allclose(np.asarray(out1a), np.asarray(ref1), rtol=1e-6, atol=1e-6)

    # Case 2: embed multiple of 128 -> lane-dense folded path (in-kernel pe tile).
    seq_len2, batch2, embed2 = 24, 2, 128
    pe128 = _make_pe(embed2, max_len=512, N=1000.0)
    x2 = jax.random.normal(k2, (seq_len2, batch2, embed2), dtype=jnp.float32)
    ref2 = x2 + pe128[:seq_len2][:, None, :]
    out2 = jax.block_until_ready(positional_encoding_forward(x2, pe128, seq_tile=8))
    np.testing.assert_allclose(np.asarray(out2), np.asarray(ref2), rtol=1e-6, atol=1e-6)
    out2a = jax.block_until_ready(positional_encoding_forward(x2, pe128))  # auto tile
    np.testing.assert_allclose(np.asarray(out2a), np.asarray(ref2), rtol=1e-6, atol=1e-6)

    # Case 3: bf16 (16-row sublane packing), folded path, auto tile.
    x3 = jax.random.normal(k3, (32, 2, 128), dtype=jnp.float32).astype(jnp.bfloat16)
    pe_b = pe128.astype(jnp.bfloat16)
    ref3 = x3 + pe_b[:32][:, None, :]
    out3 = jax.block_until_ready(positional_encoding_forward(x3, pe128))
    np.testing.assert_allclose(np.asarray(out3.astype(jnp.float32)),
                               np.asarray(ref3.astype(jnp.float32)),
                               rtol=1e-2, atol=1e-2)

    print("KERNEL_OK")
</pallas_src>

<mosaic_0001>
module attributes {stable_mosaic.version = 11 : i64} {
  func.func @_pe_add_kernel_3d(%arg0: i32, %arg1: memref<8x2x32xf32, #tpu.memory_space<vmem>>, %arg2: memref<8x1x32xf32, #tpu.memory_space<vmem>>, %arg3: memref<8x2x32xf32, #tpu.memory_space<vmem>>) attributes {dimension_semantics = [#tpu.dimension_semantics<parallel>], iteration_bounds = array<i64: 3>, scalar_prefetch = 0 : i64, scratch_operands = 0 : i64, tpu.core_type = #tpu.core_type<tc>, window_params = [{transform_indices = @transform_0, window_bounds = array<i64: 8, 2, 32>}, {transform_indices = @transform_1, window_bounds = array<i64: 8, 1, 32>}, {transform_indices = @transform_2, window_bounds = array<i64: 8, 2, 32>}]} {
    %c0 = arith.constant 0 : index
    %c0_0 = arith.constant 0 : index
    %c0_1 = arith.constant 0 : index
    %0 = vector.load %arg1[%c0, %c0_0, %c0_1] : memref<8x2x32xf32, #tpu.memory_space<vmem>>, vector<8x2x32xf32>
    %c0_2 = arith.constant 0 : index
    %c0_3 = arith.constant 0 : index
    %c0_4 = arith.constant 0 : index
    %1 = vector.load %arg2[%c0_2, %c0_3, %c0_4] : memref<8x1x32xf32, #tpu.memory_space<vmem>>, vector<8x1x32xf32>
    %2 = vector.broadcast %1 : vector<8x1x32xf32> to vector<8x2x32xf32>
    %3 = arith.addf %0, %2 : vector<8x2x32xf32>
    %c0_5 = arith.constant 0 : index
    %c0_6 = arith.constant 0 : index
    %c0_7 = arith.constant 0 : index
    %4 = vector.load %arg3[%c0_5, %c0_6, %c0_7] : memref<8x2x32xf32, #tpu.memory_space<vmem>>, vector<8x2x32xf32>
    tpu.vector_store %arg3[%c0_5, %c0_6, %c0_7], %3 {strides = array<i32>} : memref<8x2x32xf32, #tpu.memory_space<vmem>>, vector<8x2x32xf32>,
    return
  }
  func.func @transform_0(%arg0: i32) -> (i32, i32, i32) {
    %c0_i32 = arith.constant 0 : i32
    %c0_i32_0 = arith.constant 0 : i32
    %c0_i32_1 = arith.constant 0 : i32
    return %arg0, %c0_i32, %c0_i32_0 : i32, i32, i32
  }
  func.func @transform_1(%arg0: i32) -> (i32, i32, i32) {
    %c0_i32 = arith.constant 0 : i32
    %c0_i32_0 = arith.constant 0 : i32
    %c0_i32_1 = arith.constant 0 : i32
    return %arg0, %c0_i32, %c0_i32_0 : i32, i32, i32
  }
  func.func @transform_2(%arg0: i32) -> (i32, i32, i32) {
    %c0_i32 = arith.constant 0 : i32
    %c0_i32_0 = arith.constant 0 : i32
    %c0_i32_1 = arith.constant 0 : i32
    return %arg0, %c0_i32, %c0_i32_0 : i32, i32, i32
  }
}

</mosaic_0001>

<bundles_post_ra>
// kernel: _pe_forward.1
= control target key start
LH: loop header
LB: loop body
LE: loop exit
PB: predicated region body
PF: predicated region fallthrough
CT: control target
= control target key end

     0   :  { %7 = vsyncpa [#allocation3], 0  ;;  %s643_s0 = inlined_call_operand.vmem [shape: f32[20,2,32], index: 0, kind: input, shape index: {}]   ;;  %s644_s1 = inlined_call_operand.vmem [shape: f32[512,1,32], index: 1, kind: input, shape index: {}]   ;;  %s645_s2 = inlined_call_operand.hbm [shape: f32[20,2,32], index: 2, kind: output, shape index: {}]  }
   0x1   :  { %9 = vsyncpa [#allocation3 + $0x1], 0  ;;  %s498_s9 = smov 0   ;;  %s500_s10 = smov 0  }
   0x2   :  { %s502_s11 = smov 0   ;;  %s504_s12 = smov 0  }
   0x3 LB: > { %s519_s13 = sadd.s32 4294967295, %s478_s12   ;;  %s339_s14 = sadd.s32 4294967294, %s478_s12   ;;  %s478_s12 = sphi %s504_s12, %s652_s12   ;;  %s474_s11 = sphi %s502_s11, %s651_s11   ;;  %s470_s10 = sphi %s500_s10, %s650_s10   ;;  %s466_s9 = sphi %s498_s9, %s649_s9  }
   0x4   : > { %s523_s15 = sadd.s32 1, %s478_s12   ;;  %s74_s16 = sadd.s32 1, %s474_s11 }
   0x5   : > { %s71_s17 = ssub.s32 %s478_s12, %s523_s15  ;;  %p84_p0 = scmp.ne.s32.totalorder %s474_s11, %s470_s10 }
   0x6   : > { %p72_p1 = scmp.eq.s32.totalorder %s71_s17, 0  ;;  %p85_p2 = scmp.eq.s32.totalorder %s519_s13, 2 }
   0x7   : > { %p90_p3 = scmp.ne.s32.totalorder %s470_s10, %s466_s9  ;;  %p91_p4 = scmp.eq.s32.totalorder %s339_s14, 2 }
   0x8   : > { %s534_s18 = scalar_select %p72_p1, %s474_s11, %s74_s16  }
   0x9   : > { %p536_p5 = por %p85_p2, %p84_p0  ;;  %p540_p6 = por %p91_p4, %p90_p3 }
   0xa   : > { %p342_p7 = scmp.ge.s32.totalorder %s478_s12, 1  ;;  %p134_p8 = scmp.lt.s32.totalorder %s478_s12, 4 }
   0xc   : > { %p135_p9 = pnand %p342_p7, %p134_p8 }
   0xd   : > { %s161_s21 = sand.u32 (!%p135_p9), 1, %s470_s10   ;;  %s548_s22 = sshll.u32 (!%p135_p9), %s519_s13, 3 }
   0xe   : > { %138 = sbr.rel (%p135_p9) target bundleno = 66 (0x42), region = 28  ;;  %s343_s23 = sshll.u32 (!%p135_p9), %s161_s21, 4 }
   0xf   : > { %p169_p10 = scmp.lt.s32.totalorder (!%p135_p9), %s548_s22, 19  ;;  %p179_p11 = scmp.lt.s32.totalorder (!%p135_p9), %s548_s22, 511 }
  0x10   : > { %s562_s5 = scalar_lea.vmem (!%p135_p9), [#allocation2], %s343_s23  ;;  %s582_s6 = scalar_lea.sflag (!%p135_p9), [#allocation3], %s161_s21 }
  0x13   : > { %s170_s24 = scalar_select %p169_p10, %s548_s22, 19  ;;  %vm236_vm0 = vcmask 254976  }
  0x14   : > { %s180_s25 = scalar_select %p179_p11, %s548_s22, 511 }
  0x15   : > { %s345_s26 = sshll.u32 %s170_s24, 1  ;;  %s254_s7 = ssub.s32 (%p536_p5), 20, %s548_s22 }
  0x16   : > { %s172_s29 = scalar_lea.vmem %s643_s0, %s345_s26  ;;  %s181_s4 = scalar_lea.vmem %s644_s1, %s180_s25 }
  0x17   : > { %v188_v0 = vld [vmem:[%s172_s29] sm:$0x3]  ;;  %v189_v2 = vld [vmem:[%s172_s29 + $0x2] sm:$0x3]  ;;  %v190_v5 = vld [vmem:[%s172_s29 + $0x4] sm:$0x3] }
  0x18   : > { %v397_v1 = vld [vmem:[%s181_s4] ss:$0 sm:$0xff]  ;;  %v398_v3 = vld [vmem:[%s181_s4 + $0x1] ss:$0 sm:$0xff]  ;;  %v399_v6 = vld [vmem:[%s181_s4 + $0x2] ss:$0 sm:$0xff] }
  0x19   : > { %v228_v4 = vadd.f32 %v397_v1, %v188_v0  ;;  %v229_v7 = vadd.f32 %v398_v3, %v189_v2  ;;  %v191_v8 = vld [vmem:[%s172_s29 + $0x6] sm:$0x3]  ;;  %v400_v9 = vld [vmem:[%s181_s4 + $0x3] ss:$0 sm:$0xff]  ;;  %v230_v10 = vadd.f32 %v399_v6, %v190_v5  ;;  %v192_v11 = vld [vmem:[%s172_s29 + $0x8] sm:$0x3] }
  0x1a   : > { %v231_v12 = vadd.f32 %v400_v9, %v191_v8  ;;  %v401_v13 = vld [vmem:[%s181_s4 + $0x4] ss:$0 sm:$0xff]  ;;  %v193_v14 = vld [vmem:[%s172_s29 + $0xa] sm:$0x3]  ;;  %v402_v15 = vld [vmem:[%s181_s4 + $0x5] ss:$0 sm:$0xff] }
  0x1b   : > { %237 = vst.msk [vmem:[%s562_s5] sm:$0x3] %vm236_vm0, %v228_v4  ;;  %v232_v16 = vadd.f32 %v401_v13, %v192_v11  ;;  %v194_v17 = vld [vmem:[%s172_s29 + $0xc] sm:$0x3]  ;;  %v233_v18 = vadd.f32 %v402_v15, %v193_v14  ;;  %v403_v19 = vld [vmem:[%s181_s4 + $0x6] ss:$0 sm:$0xff] }
  0x1c   : > { %238 = vst.msk [vmem:[%s562_s5 + $0x2] sm:$0x3] %vm236_vm0, %v229_v7  ;;  %v195_v20 = vld [vmem:[%s172_s29 + $0xe] sm:$0x3]  ;;  %v404_v21 = vld [vmem:[%s181_s4 + $0x7] ss:$0 sm:$0xff]  ;;  %v234_v22 = vadd.f32 %v403_v19, %v194_v17 }
  0x1d   : > { %239 = vst.msk [vmem:[%s562_s5 + $0x4] sm:$0x3] %vm236_vm0, %v230_v10  ;;  %v235_v23 = vadd.f32 %v404_v21, %v195_v20  ;;  %p255_p12 = scmp.lt.s32.totalorder (%p536_p5), %s254_s7, 8 }
  0x1e   : > { %240 = vst.msk [vmem:[%s562_s5 + $0x6] sm:$0x3] %vm236_vm0, %v231_v12  ;;  %252 = sbr.rel (!%p536_p5) target bundleno = 66 (0x42), region = 32 }
  0x1f   : > { %241 = vst.msk [vmem:[%s562_s5 + $0x8] sm:$0x3] %vm236_vm0, %v232_v16 }
  0x20   : > { %242 = vst.msk [vmem:[%s562_s5 + $0xa] sm:$0x3] %vm236_vm0, %v233_v18 }
  0x21   : > { %243 = vst.msk [vmem:[%s562_s5 + $0xc] sm:$0x3] %vm236_vm0, %v234_v22 }
  0x22   : > { %244 = vst.msk [vmem:[%s562_s5 + $0xe] sm:$0x3] %vm236_vm0, %v235_v23 }
  0x23   : > { %s654_s7 = smov (!%p255_p12, %s254_s7), 8 }
  0x24   : > { %s349_s8 = sshll.u32 %s654_s7, 1 }
  0x25   : > { %s258_s14 = ssub.s32 16, %s349_s8 }
  0x26   : > { %s259_s16 = sshll.u32 %s258_s14, 4 }
  0x27   : > { %260 = vsyncadd %s582_s6, %s259_s16  ;;  %p591_p13 = scmp.ne.s32.totalorder %s349_s8, 0  ;;  %s356_s19 = sshll.u32 %s519_s13, 4 }
  0x28   : > { %s263_s23 = scalar_lea.hbm %s645_s2, %s356_s19  ;;  %s265_s24 = sshll.u32 %s562_s5, 4  ;;  %s600_s24 = int_to_ptr.vmem [resolvable:$true] %s265_s24 }
  0x29   : > { %s267_s25 = sshll.u32 %s263_s23, 4  ;;  %s353_s26 = sshll.u32 %s654_s7, 5  ;;  %s602_s25 = int_to_ptr.hbm [resolvable:$true] %s267_s25 }
  0x2a   : > { %s405_s27 = sshra.s32 %s600_s24, 4  ;;  %s407_s28 = sshrl.u32 %s353_s26, 4  ;;  %s406_s27 = int_to_ptr.vmem [resolvable:$true] %s405_s27 }
  0x2b   : > { %s412_s29 = scalar_lea.vmem %s406_s27, %s407_s28  ;;  %s480_s13 = smov [#allocation2]  }
  0x2c   : > { %p413_p0 = scmp.ne.s32.totalorder %s406_s27, %s412_s29  ;;  %s416_s30 = scalar_lea.vmem %s480_s13, 32 }
  0x2d   : > { %p418_p3 = scmp.lt.s32.totalorder %s416_s30, %s412_s29 }
  0x2e   : > { %p414_p1 = pnand %p413_p0, %p591_p13 }
  0x30   : > { %p415_p2 = pneg %p414_p1 }
  0x32   : > { %p420_p4 = pnand %p418_p3, %p415_p2 }
  0x34   : > { %423 = shalt.err (!%p420_p4)
}
  0x35   : > { %s424_s3 = sshra.s32 %s602_s25, 4  ;;  %s435_s14 = scalar_lea.hbm %s645_s2, 40  ;;  %s425_s3 = int_to_ptr.hbm [resolvable:$true] %s424_s3 }
  0x36   : > { %s431_s4 = scalar_lea.hbm %s425_s3, %s407_s28  ;;  %p436_p9 = scmp.lt.s32.totalorder %s425_s3, %s645_s2 }
  0x37   : > { %p432_p5 = scmp.ne.s32.totalorder %s425_s3, %s431_s4  ;;  %p437_p10 = scmp.lt.s32.totalorder %s435_s14, %s431_s4 }
  0x39   : > { %p433_p7 = pnand %p432_p5, %p591_p13  ;;  %p438_p11 = por %p437_p10, %p436_p9 }
  0x3b   : > { %p434_p8 = pneg %p433_p7 }
  0x3d   : > { %p439_p12 = pnand %p438_p11, %p434_p8 }
  0x3f   : > { %442 = shalt.err (!%p439_p12)
}
  0x40   : > { %s481_s21 = smov 32   ;;  %s482_s22 = smov 2  }
  0x41   : > { %273 = dma.vmem_to_hbm [thread:$0]  (%p591_p13), %s600_s24, %s353_s26, %s602_s25, %s582_s6, %s481_s21, %s481_s21, %s482_s22  }
  0x42 PF: > { %p362_p0 = scmp.ge.s32.totalorder %s478_s12, 2  ;;  %s282_s23 = sand.u32 1, %s466_s9  }
  0x43   : > { %s283_s27 = scalar_lea.sflag [#allocation3], %s282_s23 }
  0x44   : > { %p359_p1 = pnand %p362_p0, %p540_p6 }
  0x46   : > { %p360_p2 = pneg %p359_p1 }
  0x48   : > { %461 = dma.done.wait (%p360_p2), %s283_s27, 256  }
  0x49   : > { %463 = vsyncadd (%p360_p2), %s283_s27, 4294967040  ;;  %p12_p3 = scmp.ge.s32.totalorder %s523_s15, 5   ;;  %s649_s9 = smov %s470_s10 }
  0x4a   : > { %s650_s10 = smov %s474_s11  ;;  %s651_s11 = smov %s534_s18 }
  0x4b   : > { %s652_s12 = smov %s523_s15  ;;  %14 = sbr.rel (!%p12_p3) target bundleno = 3 (0x3), region = 66 }
  0x50   :  { %289 = vsyncpa [#allocation3], 1 }
  0x51   :  { %291 = vsyncpa [#allocation3 + $0x1], 1 }

</bundles_post_ra>
